<compile_context>
chip_gen: v7x
topology: tpu7x:2x2x1
jax: 0.10.0
libtpu: 0.0.40
codegen_flags: <defaults>
</compile_context>

<pallas_src>
import jax
import jax.numpy as jnp
from jax.experimental import pallas as pl
from jax.experimental.pallas import tpu as pltpu


# --------------------------------------------------------------------------
# Kernel
# --------------------------------------------------------------------------
def _packed_mlp_kernel(x_ref, w1_ref, b1_ref, w2_ref, b2_ref, o_ref):
    # x_ref : (Bblk, G*D_in)      activations for G models, model-major lanes
    # w1_ref: (G*D_in, G*H)       block-diagonal layer-1 weights (resident)
    # b1_ref: (1, G*H)
    # w2_ref: (G*H, G*D_out)      block-diagonal layer-2 weights (resident)
    # b2_ref: (1, G*D_out)
    # o_ref : (Bblk, G*D_out)     written directly in final concat layout
    x = x_ref[...]
    h = jnp.dot(x, w1_ref[...], preferred_element_type=jnp.float32)
    h = jnp.maximum(h + b1_ref[...].astype(jnp.float32), 0.0)          # ReLU
    o = jnp.dot(h.astype(w2_ref.dtype), w2_ref[...],
                preferred_element_type=jnp.float32)
    o = o + b2_ref[...].astype(jnp.float32)
    o_ref[...] = o.astype(o_ref.dtype)


# --------------------------------------------------------------------------
# Tiling helpers
# --------------------------------------------------------------------------
def _pick_group_size(M, D_in, H, D_out, lane=128):
    """Smallest divisor G of M making every packed dim a multiple of 128."""
    for G in range(1, M + 1):
        if M % G:
            continue
        if (G * D_in) % lane == 0 and (G * H) % lane == 0 and (G * D_out) % lane == 0:
            return G
    # TODO(synk): no 128-lane-dense grouping exists; G=M is correct but pays
    # masked/padded layouts.
    return M


def _pick_b_block(B, max_rows=256):
    """Batch tile: full B if small, else a fixed 256-row tile (pl.cdiv grid
    handles the ragged tail).  256 keeps the f32 intermediate h and the
    double-buffered tiles comfortably inside v7x's 64 MiB VMEM."""
    return B if B <= max_rows else max_rows


# --------------------------------------------------------------------------
# One-time weight packing (call at init, reuse across forward calls)
# --------------------------------------------------------------------------
def pack_parallel_params(w1, b1, w2, b2, lane=128):
    """Pack per-model weights (M, D_in, H)/(M, 1, H)/(M, H, D_out)/(M, 1, D_out)
    into per-group block-diagonal matrices.  Done ONCE; the forward path never
    re-materializes the (mostly-zero) padded weights."""
    M, D_in, H = w1.shape
    D_out = w2.shape[-1]
    G = _pick_group_size(M, D_in, H, D_out, lane)
    ng = M // G

    eye1 = jnp.eye(G, dtype=w1.dtype)
    w1_bd = jnp.einsum('ngdh,ge->ngdeh', w1.reshape(ng, G, D_in, H),
                       eye1).reshape(ng, G * D_in, G * H)
    eye2 = jnp.eye(G, dtype=w2.dtype)
    w2_bd = jnp.einsum('ngho,ge->ngheo', w2.reshape(ng, G, H, D_out),
                       eye2).reshape(ng, G * H, G * D_out)
    b1_p = b1.reshape(ng, 1, G * H)
    b2_p = b2.reshape(ng, 1, G * D_out)
    return {"w1": w1_bd, "b1": b1_p, "w2": w2_bd, "b2": b2_p}


# --------------------------------------------------------------------------
# Forward (hot path): transpose x + single pallas_call
# --------------------------------------------------------------------------
def parallel_combined_forward(x, packed):
    """x: (M, B, D_in); packed: output of pack_parallel_params.
    Returns (B, M*D_out) == torch.cat([model_i(x[i]) for i], dim=1)."""
    M, B, D_in = x.shape
    ng, GDin, GH = packed["w1"].shape
    GDout = packed["w2"].shape[-1]
    G = M // ng
    D_out = GDout // G

    Bblk = _pick_b_block(B)
    nb = pl.cdiv(B, Bblk)

    # Activations packed model-major along lanes: (B, M*D_in), 128-lane dense.
    x_p = jnp.transpose(x, (1, 0, 2)).reshape(B, M * D_in)

    # Explicit VMEM budget from the real per-step footprint (double-buffered
    # x/out tiles + resident weight/bias tiles + f32 intermediate h).
    a_item = jnp.dtype(x.dtype).itemsize
    w_item = jnp.dtype(packed["w1"].dtype).itemsize
    need = (2 * (Bblk * GDin + Bblk * GDout) * a_item
            + 2 * (GDin * GH + GH * GDout) * w_item
            + 2 * 8 * (GH + GDout) * w_item          # 1-row biases pad to 8 sublanes
            + Bblk * GH * 4)                         # f32 h intermediate
    vmem_limit = int(min(max(2 * need, 8 << 20), 64 << 20))

    # Advisory cost so XLA doesn't treat the custom call as free.
    flops = 2 * B * ng * (GDin * GH + GH * GDout)    # block-diagonal flops issued
    bytes_acc = (B * M * D_in * a_item + B * M * D_out * a_item
                 + ng * (GDin * GH + GH * GDout + GH + GDout) * w_item)
    cost = pl.CostEstimate(flops=int(flops), transcendentals=0,
                           bytes_accessed=int(bytes_acc))

    out = pl.pallas_call(
        _packed_mlp_kernel,
        out_shape=jax.ShapeDtypeStruct((B, M * D_out), x.dtype),
        grid_spec=pltpu.PrefetchScalarGridSpec(
            num_scalar_prefetch=0,
            # Model-group OUTER, batch-tile INNER: weight/bias blocks depend
            # only on g, so they stay VMEM-resident across the inner loop.
            grid=(ng, nb),
            in_specs=[
                pl.BlockSpec((Bblk, GDin), lambda g, b: (b, g)),
                pl.BlockSpec((None, GDin, GH), lambda g, b: (g, 0, 0)),
                pl.BlockSpec((None, 1, GH), lambda g, b: (g, 0, 0)),
                pl.BlockSpec((None, GH, GDout), lambda g, b: (g, 0, 0)),
                pl.BlockSpec((None, 1, GDout), lambda g, b: (g, 0, 0)),
            ],
            out_specs=pl.BlockSpec((Bblk, GDout), lambda g, b: (b, g)),
        ),
        compiler_params=pltpu.CompilerParams(
            dimension_semantics=("parallel", "parallel"),
            vmem_limit_bytes=vmem_limit),
        cost_estimate=cost,
    )(x_p, packed["w1"], packed["b1"], packed["w2"], packed["b2"])
    return out


# --------------------------------------------------------------------------
# Deterministic params, pure-JAX reference, and self-test
# --------------------------------------------------------------------------
def _init_params(key, M, D_in, H, D_out, dtype=jnp.float32):
    """Deterministic nn.Linear-style init (uniform +-1/sqrt(fan_in))."""
    k1, k2, k3, k4 = jax.random.split(key, 4)
    lim1 = 1.0 / (D_in ** 0.5)
    lim2 = 1.0 / (H ** 0.5)
    w1 = jax.random.uniform(k1, (M, D_in, H), dtype, -lim1, lim1)
    b1 = jax.random.uniform(k2, (M, 1, H), dtype, -lim1, lim1)
    w2 = jax.random.uniform(k3, (M, H, D_out), dtype, -lim2, lim2)
    b2 = jax.random.uniform(k4, (M, 1, D_out), dtype, -lim2, lim2)
    return w1, b1, w2, b2


def _reference(x, w1, b1, w2, b2):
    # Matches the torch loop + cat(dim=1).
    outs = []
    for i in range(x.shape[0]):
        h = jnp.maximum(x[i] @ w1[i] + b1[i], 0.0)
        outs.append(h @ w2[i] + b2[i])
    return jnp.concatenate(outs, axis=1)


if __name__ == "__main__":
    M, B, D_in, H, D_out = 4, 8, 32, 32, 32
    key = jax.random.PRNGKey(0)
    kx, kp = jax.random.split(key)
    x = jax.random.normal(kx, (M, B, D_in), jnp.float32)
    w1, b1, w2, b2 = _init_params(kp, M, D_in, H, D_out)

    packed = jax.tree_util.tree_map(jax.block_until_ready,
                                    pack_parallel_params(w1, b1, w2, b2))

    fwd = jax.jit(parallel_combined_forward)
    out = jax.block_until_ready(fwd(x, packed))

    ref = _reference(x, w1, b1, w2, b2)
    assert out.shape == (B, M * D_out), out.shape
    assert jnp.allclose(out, ref, atol=1e-5, rtol=1e-5), "mismatch vs reference"
    print("KERNEL_OK")
</pallas_src>

<mosaic_0001>
module attributes {stable_mosaic.version = 11 : i64} {
  func.func @_packed_mlp_kernel(%arg0: i32, %arg1: i32, %arg2: memref<8x128xf32, #tpu.memory_space<vmem>>, %arg3: memref<1x128x128xf32, #tpu.memory_space<vmem>>, %arg4: memref<1x1x128xf32, #tpu.memory_space<vmem>>, %arg5: memref<1x128x128xf32, #tpu.memory_space<vmem>>, %arg6: memref<1x1x128xf32, #tpu.memory_space<vmem>>, %arg7: memref<8x128xf32, #tpu.memory_space<vmem>>) attributes {dimension_semantics = [#tpu.dimension_semantics<parallel>, #tpu.dimension_semantics<parallel>], iteration_bounds = array<i64: 1, 1>, scalar_prefetch = 0 : i64, scratch_operands = 0 : i64, tpu.core_type = #tpu.core_type<tc>, window_params = [{transform_indices = @transform_0, window_bounds = array<i64: 8, 128>}, {transform_indices = @transform_1, window_bounds = array<i64: 1, 128, 128>}, {transform_indices = @transform_2, window_bounds = array<i64: 1, 1, 128>}, {transform_indices = @transform_3, window_bounds = array<i64: 1, 128, 128>}, {transform_indices = @transform_4, window_bounds = array<i64: 1, 1, 128>}, {transform_indices = @transform_5, window_bounds = array<i64: 8, 128>}]} {
    %c0 = arith.constant 0 : index
    %c0_0 = arith.constant 0 : index
    %0 = vector.load %arg2[%c0, %c0_0] : memref<8x128xf32, #tpu.memory_space<vmem>>, vector<8x128xf32>
    %c0_1 = arith.constant 0 : index
    %c0_2 = arith.constant 0 : index
    %c0_3 = arith.constant 0 : index
    %1 = vector.load %arg3[%c0_1, %c0_2, %c0_3] : memref<1x128x128xf32, #tpu.memory_space<vmem>>, vector<1x128x128xf32>
    %2 = vector.shape_cast %1 : vector<1x128x128xf32> to vector<128x128xf32>
    %cst = arith.constant dense<0.000000e+00> : vector<8x128xf32>
    %3 = tpu.matmul %0, %2, %cst {dimension_numbers = #tpu.dot_dimension_numbers<[1], [0], [0], [1], [0, 0, 1, 1], [], []>} : vector<8x128xf32>, vector<128x128xf32>, vector<8x128xf32> -> vector<8x128xf32>
    %c0_4 = arith.constant 0 : index
    %c0_5 = arith.constant 0 : index
    %c0_6 = arith.constant 0 : index
    %4 = vector.load %arg4[%c0_4, %c0_5, %c0_6] : memref<1x1x128xf32, #tpu.memory_space<vmem>>, vector<1x1x128xf32>
    %5 = vector.shape_cast %4 : vector<1x1x128xf32> to vector<1x128xf32>
    %6 = vector.broadcast %5 : vector<1x128xf32> to vector<8x128xf32>
    %7 = arith.addf %3, %6 : vector<8x128xf32>
    %cst_7 = arith.constant 0.000000e+00 : f32
    %8 = vector.broadcast %cst_7 : f32 to vector<8x128xf32>
    %9 = arith.maximumf %7, %8 : vector<8x128xf32>
    %c0_8 = arith.constant 0 : index
    %c0_9 = arith.constant 0 : index
    %c0_10 = arith.constant 0 : index
    %10 = vector.load %arg5[%c0_8, %c0_9, %c0_10] : memref<1x128x128xf32, #tpu.memory_space<vmem>>, vector<1x128x128xf32>
    %11 = vector.shape_cast %10 : vector<1x128x128xf32> to vector<128x128xf32>
    %cst_11 = arith.constant dense<0.000000e+00> : vector<8x128xf32>
    %12 = tpu.matmul %9, %11, %cst_11 {dimension_numbers = #tpu.dot_dimension_numbers<[1], [0], [0], [1], [0, 0, 1, 1], [], []>} : vector<8x128xf32>, vector<128x128xf32>, vector<8x128xf32> -> vector<8x128xf32>
    %c0_12 = arith.constant 0 : index
    %c0_13 = arith.constant 0 : index
    %c0_14 = arith.constant 0 : index
    %13 = vector.load %arg6[%c0_12, %c0_13, %c0_14] : memref<1x1x128xf32, #tpu.memory_space<vmem>>, vector<1x1x128xf32>
    %14 = vector.shape_cast %13 : vector<1x1x128xf32> to vector<1x128xf32>
    %15 = vector.broadcast %14 : vector<1x128xf32> to vector<8x128xf32>
    %16 = arith.addf %12, %15 : vector<8x128xf32>
    %c0_15 = arith.constant 0 : index
    %c0_16 = arith.constant 0 : index
    %17 = vector.load %arg7[%c0_15, %c0_16] : memref<8x128xf32, #tpu.memory_space<vmem>>, vector<8x128xf32>
    tpu.vector_store %arg7[%c0_15, %c0_16], %16 {strides = array<i32>} : memref<8x128xf32, #tpu.memory_space<vmem>>, vector<8x128xf32>,
    return
  }
  func.func @transform_0(%arg0: i32, %arg1: i32) -> (i32, i32) {
    %c0_i32 = arith.constant 0 : i32
    return %arg1, %arg0 : i32, i32
  }
  func.func @transform_1(%arg0: i32, %arg1: i32) -> (i32, i32, i32) {
    %c0_i32 = arith.constant 0 : i32
    %c0_i32_0 = arith.constant 0 : i32
    %c0_i32_1 = arith.constant 0 : i32
    return %arg0, %c0_i32, %c0_i32_0 : i32, i32, i32
  }
  func.func @transform_2(%arg0: i32, %arg1: i32) -> (i32, i32, i32) {
    %c0_i32 = arith.constant 0 : i32
    %c0_i32_0 = arith.constant 0 : i32
    %c0_i32_1 = arith.constant 0 : i32
    return %arg0, %c0_i32, %c0_i32_0 : i32, i32, i32
  }
  func.func @transform_3(%arg0: i32, %arg1: i32) -> (i32, i32, i32) {
    %c0_i32 = arith.constant 0 : i32
    %c0_i32_0 = arith.constant 0 : i32
    %c0_i32_1 = arith.constant 0 : i32
    return %arg0, %c0_i32, %c0_i32_0 : i32, i32, i32
  }
  func.func @transform_4(%arg0: i32, %arg1: i32) -> (i32, i32, i32) {
    %c0_i32 = arith.constant 0 : i32
    %c0_i32_0 = arith.constant 0 : i32
    %c0_i32_1 = arith.constant 0 : i32
    return %arg0, %c0_i32, %c0_i32_0 : i32, i32, i32
  }
  func.func @transform_5(%arg0: i32, %arg1: i32) -> (i32, i32) {
    %c0_i32 = arith.constant 0 : i32
    return %arg1, %arg0 : i32, i32
  }
}

</mosaic_0001>

<bundles_post_ra>
// kernel: parallel_combined_forward.1
= control target key start
LH: loop header
LB: loop body
LE: loop exit
PB: predicated region body
PF: predicated region fallthrough
CT: control target
= control target key end

     0   :  { %10 = vsyncpa [#allocation3], 0  ;;  %s587_s0 = inlined_call_operand.vmem [shape: f32[8,128], index: 0, kind: input, shape index: {}]   ;;  %s588_s1 = inlined_call_operand.hbm [shape: f32[1,128,128], index: 1, kind: input, shape index: {}]   ;;  %s589_s2 = inlined_call_operand.vmem [shape: f32[1,1,128], index: 2, kind: input, shape index: {}]   ;;  %s590_s3 = inlined_call_operand.hbm [shape: f32[1,128,128], index: 3, kind: input, shape index: {}]   ;;  %s591_s4 = inlined_call_operand.vmem [shape: f32[1,1,128], index: 4, kind: input, shape index: {}]   ;;  %s592_s5 = inlined_call_operand.hbm [shape: f32[8,128], index: 5, kind: output, shape index: {}]  }
   0x1   :  { %11 = vsyncpa [#allocation6], 0 }
   0x2   :  { %12 = vsyncpa [#allocation4], 0  ;;  %s488_s18 = smov [#allocation2]   ;;  %s416_s22 = scalar_lea.hbm %s588_s1, 2048 }
   0x3   :  { %s20_s19 = sshll.u32 %s488_s18, 4  ;;  %p417_p0 = scmp.ne.s32.totalorder %s588_s1, %s416_s22  ;;  %s21_s19 = int_to_ptr.vmem [resolvable:$true] %s20_s19 }
   0x4   :  { %p420_p1 = scmp.lt.u32.totalorder %s416_s22, %s588_s1 }
   0x6   :  { %p422_p2 = pnand %p420_p1, %p417_p0 }
   0x8   :  { %425 = shalt.err (!%p422_p2)
}
   0x9   :  { %s426_s27 = scalar_lea.vmem %s21_s19, 2048  ;;  %p431_p4 = scmp.lt.s32.totalorder %s21_s19, %s21_s19 }
   0xa   :  { %p427_p3 = scmp.ne.s32.totalorder %s21_s19, %s426_s27  ;;  %p432_p5 = scmp.lt.s32.totalorder %s426_s27, %s426_s27 }
   0xc   :  { %p433_p6 = por %p432_p5, %p431_p4 }
   0xe   :  { %p434_p7 = pnand %p433_p6, %p427_p3 }
  0x10   :  { %437 = shalt.err (!%p434_p7)
}
  0x11   :  { %s489_s28 = smov 128   ;;  %s490_s29 = smov 8  }
  0x12   :  { %26 = dma.hbm_to_vmem [thread:$0]  %s588_s1, 2048, %s21_s19, [#allocation3], %s489_s28, %s489_s28, %s490_s29  }
  0x13   :  { %s491_s7 = smov [#allocation5]   ;;  %s438_s11 = scalar_lea.hbm %s590_s3, 2048 }
  0x14   :  { %s34_s8 = sshll.u32 %s491_s7, 4  ;;  %p439_p8 = scmp.ne.s32.totalorder %s590_s3, %s438_s11  ;;  %s35_s8 = int_to_ptr.vmem [resolvable:$true] %s34_s8 }
  0x15   :  { %p442_p9 = scmp.lt.u32.totalorder %s438_s11, %s590_s3 }
  0x17   :  { %p444_p10 = pnand %p442_p9, %p439_p8 }
  0x19   :  { %447 = shalt.err (!%p444_p10)
}
  0x1a   :  { %s448_s16 = scalar_lea.vmem %s35_s8, 2048  ;;  %p453_p12 = scmp.lt.s32.totalorder %s35_s8, %s35_s8 }
  0x1b   :  { %p449_p11 = scmp.ne.s32.totalorder %s35_s8, %s448_s16  ;;  %p454_p13 = scmp.lt.s32.totalorder %s448_s16, %s448_s16 }
  0x1d   :  { %p455_p0 = por %p454_p13, %p453_p12 }
  0x1f   :  { %p456_p1 = pnand %p455_p0, %p449_p11 }
  0x21   :  { %459 = shalt.err (!%p456_p1)
}
  0x22   :  { %40 = dma.hbm_to_vmem [thread:$0]  %s590_s3, 2048, %s35_s8, [#allocation6], %s489_s28, %s489_s28, %s490_s29  }
  0x23   :  { %482 = dma.done.wait [#allocation3], 2048  }
  0x24   :  { %483 = vsyncadd [#allocation3], 4294965248 }
  0x25   :  { %484 = dma.done.wait [#allocation6], 2048  }
  0x26   :  { %485 = vsyncadd [#allocation6], 4294965248  ;;  %v492_v0 = vmov 0.0|0.0   ;;  %vm493_vm0 = vmmov 0   ;;  %v494_v1 = vmov 0.0   ;;  %v50_v2 = vld [vmem:[#allocation2] sm:$0xff] }
  0x27   :  { %360 = vmatprep.subr.bf16.mxu0 %v492_v0  ;;  %322 = vmatprep.mubr.msk.f32.mxu0 %vm493_vm0, %v494_v1  ;;  %v51_v3 = vld [vmem:[#allocation2 + $0x8] sm:$0xff]  ;;  %v52_v4 = vld [vmem:[#allocation2 + $0x10] sm:$0xff]  ;;  %v53_v6 = vld [vmem:[#allocation2 + $0x18] sm:$0xff] }
  0x28   :  { %384 = vmatprep.subr.bf16.mxu1 %v492_v0  ;;  %357 = vmatprep.mubr.msk.f32.mxu1 %vm493_vm0, %v494_v1  ;;  %v361_v5 = vpack.c.bf16 %v51_v3, %v50_v2  ;;  %v364_v7 = vpack.c.bf16 %v53_v6, %v52_v4  ;;  %v54_v8 = vld [vmem:[#allocation2 + $0x20] sm:$0xff]  ;;  %v55_v9 = vld [vmem:[#allocation2 + $0x28] sm:$0xff]  ;;  %v146_v12 = vld [vmem:[#allocation5 + $0x10] sm:$0xff] }
  0x29   :  { %v144_v10 = vld [vmem:[#allocation5] sm:$0xff]  ;;  %v145_v11 = vld [vmem:[#allocation5 + $0x8] sm:$0xff]  ;;  %v147_v13 = vld [vmem:[#allocation5 + $0x18] sm:$0xff]  ;;  %v367_v14 = vpack.c.bf16 %v55_v9, %v54_v8 }
  0x2a   :  { %362 = vmatpush3.bf16.msra.mxu0 %v361_v5  ;;  %v385_v15 = vpack.c.bf16 %v145_v11, %v144_v10  ;;  %v56_v16 = vld [vmem:[#allocation2 + $0x30] sm:$0xff]  ;;  %v57_v17 = vld [vmem:[#allocation2 + $0x38] sm:$0xff]  ;;  %v388_v18 = vpack.c.bf16 %v147_v13, %v146_v12  ;;  %v148_v19 = vld [vmem:[#allocation5 + $0x20] sm:$0xff] }
  0x2b   :  { %363 = vmatprep.subr.bf16.mxu0 %v492_v0  ;;  %v149_v20 = vld [vmem:[#allocation5 + $0x28] sm:$0xff]  ;;  %v370_v21 = vpack.c.bf16 %v57_v17, %v56_v16  ;;  %v58_v22 = vld [vmem:[#allocation2 + $0x40] sm:$0xff]  ;;  %v150_v25 = vld [vmem:[#allocation5 + $0x30] sm:$0xff] }
  0x2c   :  { %386 = vmatpush3.bf16.msra.mxu1 %v385_v15  ;;  %v59_v23 = vld [vmem:[#allocation2 + $0x48] sm:$0xff]  ;;  %v391_v24 = vpack.c.bf16 %v149_v20, %v148_v19  ;;  %v151_v26 = vld [vmem:[#allocation5 + $0x38] sm:$0xff]  ;;  %v60_v28 = vld [vmem:[#allocation2 + $0x50] sm:$0xff] }
  0x2d   :  { %387 = vmatprep.subr.bf16.mxu1 %v492_v0  ;;  %v373_v27 = vpack.c.bf16 %v59_v23, %v58_v22  ;;  %v61_v29 = vld [vmem:[#allocation2 + $0x58] sm:$0xff]  ;;  %v394_v30 = vpack.c.bf16 %v151_v26, %v150_v25  ;;  %v152_v31 = vld [vmem:[#allocation5 + $0x40] sm:$0xff]  ;;  %v153_v32 = vld [vmem:[#allocation5 + $0x48] sm:$0xff] }
  0x2e   :  { %365 = vmatpush3.bf16.msra.mxu0 %v364_v7  ;;  %v376_v33 = vpack.c.bf16 %v61_v29, %v60_v28  ;;  %v62_v34 = vld [vmem:[#allocation2 + $0x60] sm:$0xff]  ;;  %v63_v35 = vld [vmem:[#allocation2 + $0x68] sm:$0xff]  ;;  %v397_v36 = vpack.c.bf16 %v153_v32, %v152_v31  ;;  %v154_v37 = vld [vmem:[#allocation5 + $0x50] sm:$0xff] }
  0x2f   :  { %366 = vmatprep.subr.bf16.mxu0 %v492_v0  ;;  %v155_v38 = vld [vmem:[#allocation5 + $0x58] sm:$0xff]  ;;  %v379_v39 = vpack.c.bf16 %v63_v35, %v62_v34  ;;  %v64_v40 = vld [vmem:[#allocation2 + $0x70] sm:$0xff]  ;;  %v156_v43 = vld [vmem:[#allocation5 + $0x60] sm:$0xff] }
  0x30   :  { %389 = vmatpush3.bf16.msra.mxu1 %v388_v18  ;;  %v65_v41 = vld [vmem:[#allocation2 + $0x78] sm:$0xff]  ;;  %v400_v42 = vpack.c.bf16 %v155_v38, %v154_v37  ;;  %v157_v44 = vld [vmem:[#allocation5 + $0x68] sm:$0xff]  ;;  %v49_v47 = vld [vmem:[%s587_s0] sm:$0xff]  ;;  %s495_s0 = smov [#allocation7]  }
  0x31   :  { %390 = vmatprep.subr.bf16.mxu1 %v492_v0  ;;  %v382_v45 = vpack.c.bf16 %v65_v41, %v64_v40  ;;  %v403_v46 = vpack.c.bf16 %v157_v44, %v156_v43  ;;  %v158_v48 = vld [vmem:[#allocation5 + $0x70] sm:$0xff]  ;;  %v159_v49 = vld [vmem:[#allocation5 + $0x78] sm:$0xff]  ;;  %v254_v51 = vld [vmem:[%s589_s2] ss:$0 sm:$0xff]  ;;  %s244_s23 = sshll.u32 %s495_s0, 4  ;;  %s245_s23 = int_to_ptr.vmem [resolvable:$true] %s244_s23 }
  0x32   :  { %368 = vmatpush3.bf16.msra.mxu0 %v367_v14  ;;  %v406_v50 = vpack.c.bf16 %v159_v49, %v158_v48  ;;  %v255_v56 = vld [vmem:[%s591_s4] ss:$0 sm:$0xff]  ;;  %s460_s24 = scalar_lea.vmem %s245_s23, 128  ;;  %p465_p3 = scmp.lt.s32.totalorder %s245_s23, %s245_s23 }
  0x33   :  { %369 = vmatprep.subr.bf16.mxu0 %v492_v0  ;;  %p461_p2 = scmp.ne.s32.totalorder %s245_s23, %s460_s24  ;;  %p466_p4 = scmp.lt.s32.totalorder %s460_s24, %s460_s24 }
  0x34   :  { %392 = vmatpush3.bf16.msra.mxu1 %v391_v24 }
  0x35   :  { %393 = vmatprep.subr.bf16.mxu1 %v492_v0  ;;  %p467_p5 = por %p466_p4, %p465_p3 }
  0x36   :  { %371 = vmatpush3.bf16.msra.mxu0 %v370_v21 }
  0x37   :  { %372 = vmatprep.subr.bf16.mxu0 %v492_v0  ;;  %p468_p6 = pnand %p467_p5, %p461_p2 }
  0x38   :  { %395 = vmatpush3.bf16.msra.mxu1 %v394_v30 }
  0x39   :  { %396 = vmatprep.subr.bf16.mxu1 %v492_v0 }
  0x3a   :  { %374 = vmatpush3.bf16.msra.mxu0 %v373_v27 }
  0x3b   :  { %375 = vmatprep.subr.bf16.mxu0 %v492_v0 }
  0x3c   :  { %398 = vmatpush3.bf16.msra.mxu1 %v397_v36 }
  0x3d   :  { %399 = vmatprep.subr.bf16.mxu1 %v492_v0 }
  0x3e   :  { %377 = vmatpush3.bf16.msra.mxu0 %v376_v33 }
  0x3f   :  { %378 = vmatprep.subr.bf16.mxu0 %v492_v0 }
  0x40   :  { %401 = vmatpush3.bf16.msra.mxu1 %v400_v42 }
  0x41   :  { %402 = vmatprep.subr.bf16.mxu1 %v492_v0 }
  0x42   :  { %380 = vmatpush3.bf16.msra.mxu0 %v379_v39 }
  0x43   :  { %381 = vmatprep.subr.bf16.mxu0 %v492_v0 }
  0x44   :  { %404 = vmatpush3.bf16.msra.mxu1 %v403_v46 }
  0x45   :  { %405 = vmatprep.subr.bf16.mxu1 %v492_v0 }
  0x46   :  { %383 = vmatpush3.bf16.msra.mxu0 %v382_v45 }
  0x48   :  { %407 = vmatpush3.bf16.msra.mxu1 %v406_v50 }
  0x49   :  { %323 = vmatmul.mubr.f32.vlgmr.msra.gmra.mrb[0].mxu0 %v49_v47 }
 0x11c   :  { %v139_v52 = vpop.f32.mrb[0].mxu0 }
 0x11d   :  { %v140_v53 = vadd.f32 %v254_v51, %v139_v52  ;;  %v324_v54 = vpop.f32.mrb[1].mxu0 }
 0x11f   :  { %v143_v55 = vmax.f32 %v140_v53, 0.0 }
 0x121   :  { %358 = vmatmul.mubr.f32.vlgmr.msra.gmra.mrb[0].mxu1 %v143_v55 }
 0x1f4   :  { %v233_v57 = vpop.f32.mrb[0].mxu1 }
 0x1f5   :  { %v234_v58 = vadd.f32 %v255_v56, %v233_v57  ;;  %v359_v59 = vpop.f32.mrb[1].mxu1 }
 0x1f7   :  { %237 = vst [vmem:[#allocation7] sm:$0xff] %v234_v58 }
 0x1f8   :  { %471 = shalt.err (!%p468_p6)
}
 0x1f9   :  { %s472_s26 = scalar_lea.hbm %s592_s5, 128 }
 0x1fa   :  { %p473_p7 = scmp.ne.s32.totalorder %s592_s5, %s472_s26  ;;  %p476_p8 = scmp.lt.u32.totalorder %s472_s26, %s592_s5 }
 0x1fc   :  { %p478_p9 = pnand %p476_p8, %p473_p7 }
 0x1fe   :  { %481 = shalt.err (!%p478_p9)
}
 0x1ff   :  { %247 = dma.vmem_to_hbm [thread:$0]  %s245_s23, 128, %s592_s5, [#allocation4]  }
 0x200   :  { %486 = dma.done.wait [#allocation4], 128  }
 0x201   :  { %487 = vsyncadd [#allocation4], 4294967168 }
 0x202   :  { %251 = vsyncpa [#allocation3], 1 }
 0x203   :  { %252 = vsyncpa [#allocation6], 1 }
 0x204   :  { %253 = vsyncpa [#allocation4], 1 }

</bundles_post_ra>
